<compile_context>
chip_gen: v7x
topology: tpu7x:2x2x1
jax: 0.10.0
libtpu: 0.0.40
codegen_flags: <defaults>
</compile_context>

<pallas_src>
import functools

import jax
import jax.numpy as jnp
from jax import lax
from jax.experimental import pallas as pl
from jax.experimental.pallas import tpu as pltpu


def _einsum_scatter_kernel(y_ref, w_ref, ind_ref, o_ref, *, pack_experts):
    # y_ref  : (Bb, E, K, J)      batch block of Y
    # w_ref  : (E, J, I_pad)      W, VMEM-resident (constant block index)
    # ind_ref: (Bb, 1, E*K)       int32 indices, lane-dense
    # o_ref  : (Bb, T, I_pad)     batch block of the scattered output
    y = y_ref[...]                                   # (Bb, E, K, J)
    w = w_ref[...]                                   # (E, J, Ip)
    Bb, E, K, J = y.shape
    Ip = w.shape[-1]
    T = o_ref.shape[1]
    EK = E * K

    acc_t = jnp.float32
    # bf16 inputs -> bf16 MXU operands (fast path on v6e/v7x); f32 stays f32.
    mx_t = y.dtype if y.dtype == jnp.bfloat16 else jnp.float32

    if pack_experts:
        # One full-contraction-depth MXU matmul instead of E shallow ones.
        # Block-diagonal LHS: packed[b, e, k, e*J + j] = y[b, e, k, j].
        y_tiled = jnp.concatenate([y] * E, axis=-1)          # (Bb, E, K, E*J)
        col = lax.broadcasted_iota(jnp.int32, (Bb, E, K, E * J), 3)
        row = lax.broadcasted_iota(jnp.int32, (Bb, E, K, E * J), 1)
        mask = (col >= row * J) & (col < row * J + J)
        packed = jnp.where(mask, y_tiled, jnp.zeros_like(y_tiled))
        lhs = packed.reshape(Bb * EK, E * J)                 # (Bb*E*K, E*J)
        rhs = w.reshape(E * J, Ip)                           # (E*J, I_pad)
        x = jnp.dot(lhs, rhs, preferred_element_type=acc_t)  # (Bb*E*K, Ip)
        x = x.reshape(Bb, EK, Ip)
    else:
        # Fallback: per-expert batched matmul (used when E*J is too deep or
        # J is not sublane-aligned).
        x = jnp.einsum('bekj,eji->beki', y, w, preferred_element_type=acc_t)
        x = x.reshape(Bb, EK, Ip)

    # Scatter-add along T as a batched one-hot MXU matmul.
    # NOTE: indices outside [0, T) are silently dropped (all-zero one-hot
    # column) whereas torch.scatter_add_ would raise; identical for valid Ind.
    ind3 = ind_ref[...]                                      # (Bb, 1, EK) int32
    one_hot = (lax.broadcasted_iota(jnp.int32, (Bb, T, EK), 1)
               == ind3).astype(mx_t)                         # (Bb, T, EK)
    scat = jnp.einsum('btn,bni->bti', one_hot, x.astype(mx_t),
                      preferred_element_type=acc_t)          # (Bb, T, Ip)
    o_ref[...] = scat.astype(o_ref.dtype)


def einsum_scatter(Y, Ind, W, T, block_b=None):
    """Pallas equivalent of TorchEinsumScatter.forward(Y, Ind, T)."""
    B, E, K, J = Y.shape
    _, _, I = W.shape
    dtype = Y.dtype
    itemsize = jnp.dtype(dtype).itemsize
    sub = 16 if dtype == jnp.bfloat16 else 8

    # ---- lane-pad I (unmasked stores), sublane-pad K (layout-free reshapes) --
    I_pad = 128 * pl.cdiv(I, 128)
    K_pad = sub * pl.cdiv(K, sub)
    W_p = W if I_pad == I else jnp.pad(W, ((0, 0), (0, 0), (0, I_pad - I)))
    if K_pad != K:
        # Zero Y rows contribute zero to the scatter; index 0 for them is safe.
        Y = jnp.pad(Y, ((0, 0), (0, 0), (0, K_pad - K), (0, 0)))
        Ind = jnp.pad(Ind, ((0, 0), (0, 0), (0, K_pad - K)))
    EK = E * K_pad

    # ---- choose batch block size -------------------------------------------
    if block_b is None:
        block_b = min(B, max(1, 256 // max(EK, 1)))   # ~256 MXU rows per step
        if B > 1 and block_b >= B:
            block_b = max(1, B // 2)                  # keep >=2 steps (v7x megacore)
    Bb = max(1, int(block_b))
    B_pad = Bb * pl.cdiv(B, Bb)
    if B_pad != B:
        Y = jnp.pad(Y, ((0, B_pad - B), (0, 0), (0, 0), (0, 0)))
        Ind = jnp.pad(Ind, ((0, B_pad - B), (0, 0), (0, 0)))

    Ind_flat = Ind.astype(jnp.int32).reshape(B_pad, 1, EK)

    # Pack experts along the contraction when they fit one MXU pass depth.
    pack_experts = (E * J <= 256) and (J % sub == 0)
    kernel = functools.partial(_einsum_scatter_kernel, pack_experts=pack_experts)

    # ---- VMEM budget (double-buffered blocks + resident W + intermediates) --
    y_blk = Bb * E * K_pad * J * itemsize
    ind_blk = Bb * EK * 4
    out_blk = Bb * T * I_pad * itemsize
    w_bytes = E * J * I_pad * itemsize
    interm = (Bb * EK * E * J * itemsize          # packed LHS (+mask/tile)
              + Bb * EK * I_pad * 4               # X accumulator
              + Bb * T * EK * 4                   # one-hot
              + Bb * T * I_pad * 4)               # scatter accumulator
    need = 2 * (y_blk + ind_blk + out_blk) + 2 * w_bytes + 2 * interm
    vmem_limit = int(min(max(need, 32 * 1024 * 1024), 64 * 1024 * 1024))

    # ---- cost hint for the surrounding XLA schedule -------------------------
    expert_depth = (E * J) if pack_experts else J
    flops = 2 * B_pad * (EK * expert_depth * I_pad + T * EK * I_pad)
    bytes_accessed = (Y.size * itemsize + W_p.size * itemsize
                      + Ind_flat.size * 4 + B_pad * T * I_pad * itemsize)
    cost = pl.CostEstimate(flops=flops, transcendentals=0,
                           bytes_accessed=bytes_accessed)

    out = pl.pallas_call(
        kernel,
        out_shape=jax.ShapeDtypeStruct((B_pad, T, I_pad), dtype),
        grid_spec=pltpu.PrefetchScalarGridSpec(
            num_scalar_prefetch=0,
            grid=(B_pad // Bb,),
            in_specs=[
                pl.BlockSpec((Bb, E, K_pad, J), lambda b: (b, 0, 0, 0)),
                # Constant block index -> W DMA'd once, resident for all steps.
                pl.BlockSpec((E, J, I_pad), lambda b: (0, 0, 0)),
                pl.BlockSpec((Bb, 1, EK), lambda b: (b, 0, 0)),
            ],
            out_specs=pl.BlockSpec((Bb, T, I_pad), lambda b: (b, 0, 0)),
        ),
        compiler_params=pltpu.CompilerParams(
            dimension_semantics=("parallel",),
            vmem_limit_bytes=vmem_limit),
        cost_estimate=cost,
    )(Y, W_p, Ind_flat)

    return out[:B, :, :I]


def _reference(Y, Ind, W, T):
    # Plain-JAX reference for correctness check.
    X = jnp.einsum('bekj,eji->beki', Y, W)                # (B, E, K, I)
    B, E, K, I = X.shape
    Xf = X.reshape(B, E * K, I)
    Indf = Ind.reshape(B, E * K)
    one_hot = jax.nn.one_hot(Indf, T, dtype=Y.dtype)      # (B, E*K, T)
    return jnp.einsum('bnt,bni->bti', one_hot, Xf)        # (B, T, I)


if __name__ == "__main__":
    # Small shapes consistent with the module's forward.
    B, E, K, J, I, T = 2, 4, 8, 32, 32, 16

    key = jax.random.PRNGKey(0)
    k_w, k_y, k_ind = jax.random.split(key, 3)

    # Parameter init: torch.rand(E, J, I) ~ U[0, 1)
    W = jax.random.uniform(k_w, (E, J, I), dtype=jnp.float32)
    Y = jax.random.uniform(k_y, (B, E, K, J), dtype=jnp.float32)
    Ind = jax.random.randint(k_ind, (B, E, K), 0, T, dtype=jnp.int32)

    out = einsum_scatter(Y, Ind, W, T)
    jax.block_until_ready(out)

    ref = _reference(Y, Ind, W, T)
    assert out.shape == (B, T, I)
    assert jnp.allclose(out, ref, atol=1e-4, rtol=1e-4)
    print("KERNEL_OK")
</pallas_src>

<mosaic_0001>
module attributes {stable_mosaic.version = 11 : i64} {
  func.func @_einsum_scatter_kernel(%arg0: i32, %arg1: memref<1x4x8x32xf32, #tpu.memory_space<vmem>>, %arg2: memref<4x32x128xf32, #tpu.memory_space<vmem>>, %arg3: memref<1x1x32xi32, #tpu.memory_space<vmem>>, %arg4: memref<1x16x128xf32, #tpu.memory_space<vmem>>) attributes {dimension_semantics = [#tpu.dimension_semantics<parallel>], iteration_bounds = array<i64: 2>, scalar_prefetch = 0 : i64, scratch_operands = 0 : i64, tpu.core_type = #tpu.core_type<tc>, window_params = [{transform_indices = @transform_0, window_bounds = array<i64: 1, 4, 8, 32>}, {pipeline_mode = #tpu.pipeline_mode<synchronous>, transform_indices = @transform_1, window_bounds = array<i64: 4, 32, 128>}, {transform_indices = @transform_2, window_bounds = array<i64: 1, 1, 32>}, {transform_indices = @transform_3, window_bounds = array<i64: 1, 16, 128>}]} {
    %c0 = arith.constant 0 : index
    %c0_0 = arith.constant 0 : index
    %c0_1 = arith.constant 0 : index
    %c0_2 = arith.constant 0 : index
    %0 = vector.load %arg1[%c0, %c0_0, %c0_1, %c0_2] : memref<1x4x8x32xf32, #tpu.memory_space<vmem>>, vector<1x4x8x32xf32>
    %c0_3 = arith.constant 0 : index
    %c0_4 = arith.constant 0 : index
    %c0_5 = arith.constant 0 : index
    %1 = vector.load %arg2[%c0_3, %c0_4, %c0_5] : memref<4x32x128xf32, #tpu.memory_space<vmem>>, vector<4x32x128xf32>
    %2 = tpu.concatenate %0, %0, %0, %0 in 3 : vector<1x4x8x32xf32>, vector<1x4x8x32xf32>, vector<1x4x8x32xf32>, vector<1x4x8x32xf32> -> vector<1x4x8x128xf32>
    %3 = tpu.iota {dimensions = array<i32: 3>} : vector<1x4x8x128xi32>
    %4 = tpu.iota {dimensions = array<i32: 1>} : vector<1x4x8x128xi32>
    %c32_i32 = arith.constant 32 : i32
    %5 = vector.broadcast %c32_i32 : i32 to vector<1x4x8x128xi32>
    %6 = arith.muli %4, %5 : vector<1x4x8x128xi32>
    %7 = arith.cmpi sge, %3, %6 : vector<1x4x8x128xi32>
    %c32_i32_6 = arith.constant 32 : i32
    %8 = vector.broadcast %c32_i32_6 : i32 to vector<1x4x8x128xi32>
    %9 = arith.muli %4, %8 : vector<1x4x8x128xi32>
    %c32_i32_7 = arith.constant 32 : i32
    %10 = vector.broadcast %c32_i32_7 : i32 to vector<1x4x8x128xi32>
    %11 = arith.addi %9, %10 : vector<1x4x8x128xi32>
    %12 = arith.cmpi slt, %3, %11 : vector<1x4x8x128xi32>
    %13 = arith.andi %7, %12 : vector<1x4x8x128xi1>
    %cst = arith.constant 0.000000e+00 : f32
    %14 = vector.broadcast %cst : f32 to vector<1x4x8x128xf32>
    %15 = arith.select %13, %2, %14 : vector<1x4x8x128xi1>, vector<1x4x8x128xf32>
    %16 = vector.shape_cast %15 : vector<1x4x8x128xf32> to vector<32x128xf32>
    %17 = vector.shape_cast %1 : vector<4x32x128xf32> to vector<128x128xf32>
    %cst_8 = arith.constant dense<0.000000e+00> : vector<32x128xf32>
    %18 = tpu.matmul %16, %17, %cst_8 {dimension_numbers = #tpu.dot_dimension_numbers<[1], [0], [0], [1], [0, 0, 1, 1], [], []>} : vector<32x128xf32>, vector<128x128xf32>, vector<32x128xf32> -> vector<32x128xf32>
    %19 = vector.shape_cast %18 : vector<32x128xf32> to vector<1x32x128xf32>
    %c0_9 = arith.constant 0 : index
    %c0_10 = arith.constant 0 : index
    %c0_11 = arith.constant 0 : index
    %20 = vector.load %arg3[%c0_9, %c0_10, %c0_11] : memref<1x1x32xi32, #tpu.memory_space<vmem>>, vector<1x1x32xi32>
    %21 = tpu.iota {dimensions = array<i32: 1>} : vector<1x16x32xi32>
    %22 = vector.broadcast %20 : vector<1x1x32xi32> to vector<1x16x32xi32>
    %23 = arith.cmpi eq, %21, %22 : vector<1x16x32xi32>
    %24 = arith.extui %23 : vector<1x16x32xi1> to vector<1x16x32xi32>
    %25 = arith.sitofp %24 : vector<1x16x32xi32> to vector<1x16x32xf32>
    "tpu.trace_start"() <{level = 10 : i32, message = "btn,bni->bti"}> : () -> ()
    %cst_12 = arith.constant dense<0.000000e+00> : vector<1x16x128xf32>
    %26 = tpu.matmul %25, %19, %cst_12 {dimension_numbers = #tpu.dot_dimension_numbers<[2], [1], [1], [2], [0, 0, 0, 1, 1, 2], [0], [0]>} : vector<1x16x32xf32>, vector<1x32x128xf32>, vector<1x16x128xf32> -> vector<1x16x128xf32>
    "tpu.trace_stop"() : () -> ()
    %c0_13 = arith.constant 0 : index
    %c0_14 = arith.constant 0 : index
    %c0_15 = arith.constant 0 : index
    %27 = vector.load %arg4[%c0_13, %c0_14, %c0_15] : memref<1x16x128xf32, #tpu.memory_space<vmem>>, vector<1x16x128xf32>
    tpu.vector_store %arg4[%c0_13, %c0_14, %c0_15], %26 {strides = array<i32>} : memref<1x16x128xf32, #tpu.memory_space<vmem>>, vector<1x16x128xf32>,
    return
  }
  func.func @transform_0(%arg0: i32) -> (i32, i32, i32, i32) {
    %c0_i32 = arith.constant 0 : i32
    %c0_i32_0 = arith.constant 0 : i32
    %c0_i32_1 = arith.constant 0 : i32
    %c0_i32_2 = arith.constant 0 : i32
    return %arg0, %c0_i32, %c0_i32_0, %c0_i32_1 : i32, i32, i32, i32
  }
  func.func @transform_1(%arg0: i32) -> (i32, i32, i32) {
    %c0_i32 = arith.constant 0 : i32
    %c0_i32_0 = arith.constant 0 : i32
    %c0_i32_1 = arith.constant 0 : i32
    %c0_i32_2 = arith.constant 0 : i32
    return %c0_i32, %c0_i32_0, %c0_i32_1 : i32, i32, i32
  }
  func.func @transform_2(%arg0: i32) -> (i32, i32, i32) {
    %c0_i32 = arith.constant 0 : i32
    %c0_i32_0 = arith.constant 0 : i32
    %c0_i32_1 = arith.constant 0 : i32
    return %arg0, %c0_i32, %c0_i32_0 : i32, i32, i32
  }
  func.func @transform_3(%arg0: i32) -> (i32, i32, i32) {
    %c0_i32 = arith.constant 0 : i32
    %c0_i32_0 = arith.constant 0 : i32
    %c0_i32_1 = arith.constant 0 : i32
    return %arg0, %c0_i32, %c0_i32_0 : i32, i32, i32
  }
}

</mosaic_0001>

<bundles_post_ra>
// kernel: tpu_custom_call.1
= control target key start
LH: loop header
LB: loop body
LE: loop exit
PB: predicated region body
PF: predicated region fallthrough
CT: control target
= control target key end

     0   :  { %8 = vsyncpa [#allocation3], 0  ;;  %s1222_s0 = inlined_call_operand.hbm [shape: f32[2,4,8,32], index: 0, kind: input, shape index: {}]   ;;  %s1223_s1 = inlined_call_operand.hbm [shape: f32[4,32,128], index: 1, kind: input, shape index: {}]   ;;  %s1224_s2 = inlined_call_operand.vmem [shape: s32[2,1,32], index: 2, kind: input, shape index: {}]   ;;  %s1225_s3 = inlined_call_operand.hbm [shape: f32[2,16,128], index: 3, kind: output, shape index: {}]  }
   0x1   :  { %10 = vsyncpa [#allocation3 + $0x1], 0 }
   0x2   :  { %11 = vsyncpa [#allocation6], 0 }
   0x3   :  { %12 = vsyncpa [#allocation4], 0 }
   0x4   :  { %14 = vsyncpa [#allocation4 + $0x1], 0  ;;  %s967_s12 = smov 0   ;;  %s969_s13 = smov 0  }
   0x5   :  { %s971_s14 = smov 0   ;;  %s973_s15 = smov 0  }
   0x6 LB: > { %s988_s16 = sadd.s32 4294967295, %s934_s15   ;;  %s599_s17 = sadd.s32 4294967294, %s934_s15   ;;  %s934_s15 = sphi %s973_s15, %s1245_s15   ;;  %s930_s14 = sphi %s971_s14, %s1244_s14   ;;  %s926_s13 = sphi %s969_s13, %s1243_s13   ;;  %s922_s12 = sphi %s967_s12, %s1242_s12  }
   0x7   : > { %p40_p0 = scmp.ne.s32.totalorder %s926_s13, %s922_s12  ;;  %p1226_p1 = scmp.eq.s32.totalorder %s988_s16, 0 }
   0x8   : > { %p117_p3 = scmp.eq.s32.totalorder %s599_s17, 1  ;;  %p600_p5 = scmp.ge.s32.totalorder %s934_s15, 1 }
   0x9   : > { %p997_p4 = por %p1226_p1, %p40_p0  ;;  %p124_p7 = scmp.lt.s32.totalorder %s934_s15, 3 }
   0xa   : > { %p1002_p6 = por %p117_p3, %p40_p0  ;;  %s936_s21 = smov [#allocation5]  }
   0xb   : > { %s1229_s18 = scalar_select %p997_p4, 1, 0 }
   0xc   : > { %s1230_s19 = scalar_select %p1002_p6, 1, 0 }
   0xd   : > { %p1007_p8 = pnand %p600_p5, %p124_p7  ;;  %s136_s22 = sshll.u32 %s936_s21, 4  ;;  %s1011_s22 = int_to_ptr.vmem [resolvable:$true] %s136_s22 }
   0xe   : > { %s1023_s24 = sadd.s32 1, %s934_s15   ;;  %s27_s25 = sadd.s32 1, %s930_s14 }
   0xf   : > { %s1231_s20 = scalar_select %p1007_p8, 1, 0 }
  0x10   : > { %p749_p9 = pneg %p1007_p8  ;;  %s24_s26 = ssub.s32 %s934_s15, %s1023_s24 }
  0x11   : > { %s806_s29 = scalar_lea.hbm %s1223_s1, 2048 }
  0x12   : > { %p1018_p11 = pnand %p749_p9, %p1226_p1  ;;  %p807_p12 = scmp.ne.s32.totalorder %s1223_s1, %s806_s29 }
  0x13   : > { %p813_p5 = scmp.lt.u32.totalorder %s806_s29, %s1223_s1 }
  0x14   : > { %p808_p13 = pneg %p1018_p11 }
  0x16   : > { %p809_p0 = pnand %p808_p13, %p807_p12 }
  0x18   : > { %p810_p3 = pneg %p809_p0 }
  0x1a   : > { %p815_p7 = pnand %p813_p5, %p810_p3 }
  0x1c   : > { %818 = shalt.err (!%p815_p7)
}
  0x1d   : > { %s819_s7 = scalar_lea.vmem %s1011_s22, 2048  ;;  %p827_p2 = scmp.lt.s32.totalorder %s1011_s22, %s1011_s22 }
  0x1e   : > { %p820_p9 = scmp.ne.s32.totalorder %s1011_s22, %s819_s7  ;;  %p828_p6 = scmp.lt.s32.totalorder %s819_s7, %s819_s7 }
  0x20   : > { %p822_p10 = pnand %p820_p9, %p808_p13  ;;  %p829_p4 = por %p828_p6, %p827_p2 }
  0x22   : > { %p823_p1 = pneg %p822_p10 }
  0x24   : > { %p830_p8 = pnand %p829_p4, %p823_p1 }
  0x26   : > { %833 = shalt.err (!%p830_p8)
}
  0x27   : > { %s937_s8 = smov 128   ;;  %s938_s9 = smov 8  }
  0x28   : > { %752 = dma.hbm_to_vmem [thread:$0]  (!%p1018_p11), %s1223_s1, 2048, %s1011_s22, [#allocation6], %s937_s8, %s937_s8, %s938_s9  }
  0x29   : > { %p25_p1 = scmp.eq.s32.totalorder %s24_s26, 0  ;;  %p34_p2 = scmp.ne.s32.totalorder %s930_s14, %s926_s13 }
  0x2a   : > { %p35_p4 = scmp.eq.s32.totalorder %s934_s15, 0  ;;  %p762_p6 = scmp.lt.s32.totalorder %s934_s15, 2 }
  0x2b   : > { %s1057_s17 = scalar_select %p25_p1, %s930_s14, %s27_s25  }
  0x2c   : > { %p36_p8 = por %p35_p4, %p34_p2  ;;  %p1233_p10 = scmp.eq.s32.totalorder %s988_s16, 1 }
  0x2d   : > { %s150_s23 = sand.u32 1, %s930_s14   ;;  %s624_s27 = sshll.u32 %s934_s15, 9 }
  0x2e   : > { %p1061_p12 = por %p1233_p10, %p34_p2  ;;  %s603_s28 = sshll.u32 %s150_s23, 5 }
  0x2f   : > { %s1070_s4 = scalar_lea.hbm %s1222_s0, %s624_s27  ;;  %s154_s22 = scalar_lea.vmem [#allocation2], %s603_s28 }
  0x30   : > { %s161_s25 = sshll.u32 %s154_s22, 4  ;;  %p1072_p11 = pnand %p762_p6, %p36_p8  ;;  %s1076_s25 = int_to_ptr.vmem [resolvable:$true] %s161_s25 }
  0x31   : > { %s1078_s5 = scalar_lea.sflag [#allocation3], %s150_s23  ;;  %s834_s6 = scalar_lea.hbm %s1070_s4, 512 }
  0x32   : > { %p835_p13 = scmp.ne.s32.totalorder %s1070_s4, %s834_s6  ;;  %p836_p0 = pneg %p1072_p11 }
  0x33   : > { %s839_s11 = scalar_lea.hbm %s1222_s0, 1024  ;;  %p840_p7 = scmp.lt.u32.totalorder %s1070_s4, %s1222_s0 }
  0x34   : > { %p837_p3 = pnand %p836_p0, %p835_p13  ;;  %p841_p9 = scmp.lt.u32.totalorder %s839_s11, %s834_s6 }
  0x35   : > { %p843_p2 = scmp.lt.u32.totalorder %s834_s6, %s1070_s4 }
  0x36   : > { %p838_p5 = pneg %p837_p3  ;;  %p842_p1 = por %p841_p9, %p840_p7 }
  0x38   : > { %p844_p4 = por %p843_p2, %p842_p1 }
  0x3a   : > { %p845_p6 = pnand %p844_p4, %p838_p5 }
  0x3c   : > { %848 = shalt.err (!%p845_p6)
}
  0x3d   : > { %s849_s23 = scalar_lea.vmem %s1076_s25, 512  ;;  %s939_s29 = smov [#allocation2]  }
  0x3e   : > { %p850_p8 = scmp.ne.s32.totalorder %s1076_s25, %s849_s23  ;;  %s854_s30 = sshll.u32 %s939_s29, 4  ;;  %s855_s30 = int_to_ptr.vmem [resolvable:$false] %s854_s30 }
  0x3f   : > { %s856_s22 = scalar_lea.vmem %s855_s30, 1024  ;;  %p857_p3 = scmp.lt.s32.totalorder %s1076_s25, %s855_s30 }
  0x40   : > { %p852_p10 = pnand %p850_p8, %p836_p0  ;;  %p858_p7 = scmp.lt.s32.totalorder %s856_s22, %s849_s23 }
  0x42   : > { %p853_p13 = pneg %p852_p10  ;;  %p859_p9 = por %p858_p7, %p857_p3 }
  0x44   : > { %p860_p1 = pnand %p859_p9, %p853_p13 }
  0x46   : > { %863 = shalt.err (!%p860_p1)
}
  0x47   : > { %756 = dma.hbm_to_vmem [thread:$0]  (!%p1072_p11), %s1070_s4, 512, %s1076_s25, %s1078_s5, %s937_s8, %s937_s8, %s938_s9  }
  0x48   : > { %p1236_p0 = scmp.ne.s32.totalorder %s1231_s20, 0 }
  0x49   : > { %s1112_s6 = sand.u32 (!%p1236_p0), 1, %s926_s13   ;;  %p1237_p5 = scmp.ne.s32.totalorder (!%p1236_p0), %s1229_s18, 0 }
  0x4a   : > { %179 = sbr.rel (%p1236_p0) target bundleno = 670 (0x29e), region = 32  ;;  %s607_s7 = sshll.u32 (!%p1236_p0), %s1112_s6, 5 }
  0x4b   : > { %s182_s10 = scalar_lea.sflag (!%p1236_p0), [#allocation3], %s1112_s6  ;;  %s1116_s11 = scalar_lea.vmem (!%p1236_p0), [#allocation2], %s607_s7 }
  0x51   : > { %909 = dma.done.wait (%p1237_p5), %s182_s10, 512  }
  0x52   : > { %911 = vsyncadd (%p1237_p5), %s182_s10, 4294966784  ;;  %p1238_p11 = scmp.eq.s32.totalorder %s988_s16, 0 }
  0x54   : > { %913 = dma.done.wait (%p1238_p11), [#allocation6], 2048   ;;  %p1239_p2 = pmov %p1238_p11 }
  0x55   : > { %v1127_v0 = vld [vmem:[%s1116_s11] sm:$0xff]  ;;  %s940_s20 = smov 64   ;;  %s941_s8 = smov 32   ;;  %v223_v2 = vld [vmem:[#allocation5 + $0x8] sm:$0xff]  ;;  %v224_v5 = vld [vmem:[#allocation5 + $0x10] sm:$0xff]  ;;  %v293_v28 = vlaneseq  ;;  %vm278_vm0 = vcmask 261120  }
  0x56   : > { %915 = vsyncadd (%p1239_p2), [#allocation6], 4294965248  ;;  %254 = vrot.lane.b32.xlu1 %v1127_v0, %s940_s20  ;;  %242 = vrot.lane.b32.xlu0 %v1127_v0, %s941_s8  ;;  %v222_v1 = vld [vmem:[#allocation5] sm:$0xff]  ;;  %v219_v3 = vld [vmem:[%s1116_s11 + $0x8] sm:$0xff]  ;;  %s942_s18 = smov 96   ;;  %vm283_vm1 = vcmask 523264  }
  0x57   : > { %v701_v4 = vpack.c.bf16 %v223_v2, %v222_v1  ;;  %v225_v6 = vld [vmem:[#allocation5 + $0x18] sm:$0xff]  ;;  %v226_v8 = vld [vmem:[#allocation5 + $0x20] sm:$0xff]  ;;  %v227_v9 = vld [vmem:[#allocation5 + $0x28] sm:$0xff]  ;;  %v294_v31 = vand.u32 127, %v293_v28  ;;  %vm288_vm4 = vcmask 785408   ;;  %p215_p4 = scmp.lt.s32.totalorder %s988_s16, 1 }
  0x58   : > { %v705_v7 = vpack.c.bf16 %v225_v6, %v224_v5  ;;  %v709_v10 = vpack.c.bf16 %v227_v9, %v226_v8  ;;  %v228_v11 = vld [vmem:[#allocation5 + $0x30] sm:$0xff]  ;;  %v229_v12 = vld [vmem:[#allocation5 + $0x38] sm:$0xff]  ;;  %v230_v16 = vld [vmem:[#allocation5 + $0x40] sm:$0xff]  ;;  %v398_v54 = vshrl.u32 %v293_v28, 7  ;;  %v943_v57 = vmov 0.0   ;;  %s609_s5 = sshll.u32 %s1112_s6, 4 }
  0x59   : > { %702 = vmatprep.subr.bf16.mxu0 %v701_v4  ;;  %v1136_v13 = vld [vmem:[%s1116_s11 + $0x18] sm:$0xff]  ;;  %v1139_v14 = vld [vmem:[%s1116_s11 + $0x10] sm:$0xff]  ;;  %v713_v15 = vpack.c.bf16 %v229_v12, %v228_v11  ;;  %v231_v17 = vld [vmem:[#allocation5 + $0x48] sm:$0xff]  ;;  %vm296_vm2 = vcmp.ge.s32.totalorder %v294_v31, 32  ;;  %vm300_vm3 = vcmp.lt.s32.totalorder %v294_v31, 64  ;;  %vm299_vm5 = vcmp.lt.s32.totalorder %v294_v31, 32 }
  0x5a   : > { %256 = vrot.lane.b32.xlu1 %v219_v3, %s940_s20  ;;  %244 = vrot.lane.b32.xlu0 %v219_v3, %s941_s8  ;;  %v717_v18 = vpack.c.bf16 %v231_v17, %v230_v16  ;;  %v232_v19 = vld [vmem:[#allocation5 + $0x50] sm:$0xff]  ;;  %v233_v20 = vld [vmem:[#allocation5 + $0x58] sm:$0xff]  ;;  %v234_v22 = vld [vmem:[#allocation5 + $0x60] sm:$0xff]  ;;  %vm297_vm7 = vcmp.ge.s32.totalorder %v294_v31, 64  ;;  %vm301_vm8 = vcmp.lt.s32.totalorder %v294_v31, 96  ;;  %vm298_vm10 = vcmp.ge.s32.totalorder %v294_v31, 96 }
  0x5b   : > { %704 = vmatpush3.bf16.msra.mxu0 %v701_v4  ;;  %v721_v21 = vpack.c.bf16 %v233_v20, %v232_v19  ;;  %v235_v23 = vld [vmem:[#allocation5 + $0x68] sm:$0xff]  ;;  %v236_v25 = vld [vmem:[#allocation5 + $0x70] sm:$0xff]  ;;  %v237_v26 = vld [vmem:[#allocation5 + $0x78] sm:$0xff]  ;;  %s216_s9 = scalar_select %p215_p4, %s988_s16, 1  ;;  %v399_v56 = vadd.s32 8, %v398_v54 }
  0x5c   : > { %706 = vmatprep.subr.bf16.mxu0 %v705_v7  ;;  %v725_v24 = vpack.c.bf16 %v235_v23, %v234_v22  ;;  %v729_v27 = vpack.c.bf16 %v237_v26, %v236_v25  ;;  %vm304_vm6 = vmand %vm296_vm2, %vm300_vm3  ;;  %s214_s27 = scalar_lea.vmem [#allocation7], %s609_s5  ;;  %s625_s23 = sshll.u32 %s988_s16, 8 }
  0x5d   : > { %vm305_vm9 = vmand %vm297_vm7, %vm301_vm8  ;;  %s217_s26 = scalar_lea.vmem %s1224_s2, %s216_s9  ;;  %s507_s28 = sshll.u32 %s214_s27, 4  ;;  %s1173_s28 = int_to_ptr.vmem [resolvable:$true] %s507_s28 }
  0x5e   : > { %268 = vrot.lane.b32.xlu1 %v219_v3, %s942_s18  ;;  %266 = vrot.lane.b32.xlu0 %v1127_v0, %s942_s18  ;;  %v614_v55 = vld [vmem:[%s217_s26] ss:$0 sm:$0xff]  ;;  %s1178_s22 = scalar_lea.hbm %s1225_s3, %s625_s23  ;;  %s494_s7 = scalar_lea.sflag [#allocation4], %s1112_s6 }
  0x5f   : > { %708 = vmatpush3.bf16.msra.mxu0 %v705_v7  ;;  %vm404_vm11 = vcmp.eq.s32.totalorder %v398_v54, %v614_v55  ;;  %vm405_vm12 = vcmp.eq.s32.totalorder %v399_v56, %v614_v55  ;;  %s864_s10 = scalar_lea.vmem %s1173_s28, 256  ;;  %s944_s16 = smov [#allocation7]  }
  0x60   : > { %710 = vmatprep.subr.bf16.mxu0 %v709_v10  ;;  %v615_v58 = vsel %vm404_vm11, 1.0, %v943_v57  ;;  %v616_v59 = vsel %vm405_vm12, 1.0, %v943_v57  ;;  %p865_p6 = scmp.ne.s32.totalorder %s1173_s28, %s864_s10  ;;  %s868_s11 = sshll.u32 %s944_s16, 4  ;;  %s869_s11 = int_to_ptr.vmem [resolvable:$false] %s868_s11 }
  0x61   : > { %698 = vmatprep.mubr.msk.f32.mxu1 %vm278_vm0, %v615_v58  ;;  %p871_p13 = scmp.lt.s32.totalorder %s1173_s28, %s869_s11 }
  0x62   : > { %248 = vrot.lane.b32.xlu1 %v1136_v13, %s941_s8  ;;  %246 = vrot.lane.b32.xlu0 %v1139_v14, %s941_s8  ;;  %p866_p8 = pnand %p865_p6, %p1061_p12 }
  0x63   : > { %712 = vmatpush3.bf16.msra.mxu0 %v709_v10 }
  0x64   : > { %714 = vmatprep.subr.bf16.mxu0 %v713_v15  ;;  %p867_p10 = pneg %p866_p8 }
  0x66   : > { %260 = vrot.lane.b32.xlu1 %v1136_v13, %s940_s20  ;;  %258 = vrot.lane.b32.xlu0 %v1139_v14, %s940_s20  ;;  %s870_s20 = scalar_lea.vmem %s869_s11, 512 }
  0x67   : > { %716 = vmatpush3.bf16.msra.mxu0 %v713_v15  ;;  %p872_p3 = scmp.lt.s32.totalorder %s870_s20, %s864_s10 }
  0x68   : > { %718 = vmatprep.subr.bf16.mxu0 %v717_v18 }
  0x69   : > { %p873_p7 = por %p872_p3, %p871_p13 }
  0x6a   : > { %272 = vrot.lane.b32.xlu1 %v1136_v13, %s942_s18  ;;  %270 = vrot.lane.b32.xlu0 %v1139_v14, %s942_s18 }
  0x6b   : > { %720 = vmatpush3.bf16.msra.mxu0 %v717_v18  ;;  %p874_p9 = pnand %p873_p7, %p867_p10 }
  0x6c   : > { %722 = vmatprep.subr.bf16.mxu0 %v721_v21 }
  0x6f   : > { %724 = vmatpush3.bf16.msra.mxu0 %v721_v21 }
  0x70   : > { %726 = vmatprep.subr.bf16.mxu0 %v725_v24 }
  0x73   : > { %728 = vmatpush3.bf16.msra.mxu0 %v725_v24 }
  0x74   : > { %730 = vmatprep.subr.bf16.mxu0 %v729_v27 }
  0x77   : > { %732 = vmatpush3.bf16.msra.mxu0 %v729_v27 }
  0xc8   : > { %v255_v29 = vpop.permute.xlu1 %254  ;;  %v243_v30 = vpop.permute.xlu0 %242 }
  0xc9   : > { %v279_v34 = vsel %vm278_vm0, %v1127_v0, %v243_v30 }
  0xca   : > { %v284_v39 = vsel %vm283_vm1, %v279_v34, %v255_v29 }
  0xcc   : > { %v257_v32 = vpop.permute.xlu1 %256  ;;  %v245_v33 = vpop.permute.xlu0 %244 }
  0xcd   : > { %v280_v35 = vsel %vm278_vm0, %v219_v3, %v245_v33 }
  0xce   : > { %v285_v37 = vsel %vm283_vm1, %v280_v35, %v257_v32 }
  0xd0   : > { %v269_v36 = vpop.permute.xlu1 %268  ;;  %v267_v38 = vpop.permute.xlu0 %266 }
  0xd1   : > { %v290_v40 = vsel %vm288_vm4, %v285_v37, %v269_v36  ;;  %v289_v41 = vsel %vm288_vm4, %v284_v39, %v267_v38 }
  0xd2   : > { %684 = vmatprep.mubr.msk.f32.mxu0 %vm299_vm5, %v289_v41 }
  0xd3   : > { %685 = vmatmul.mubr.msk.f32.vlgmr.msra.gmra.mrb[0].mxu0 %vm304_vm6, %v290_v40 }
  0xd4   : > { %v249_v42 = vpop.permute.xlu1 %248  ;;  %v247_v43 = vpop.permute.xlu0 %246 }
  0xd5   : > { %v282_v46 = vsel %vm278_vm0, %v1136_v13, %v249_v42  ;;  %v281_v47 = vsel %vm278_vm0, %v1139_v14, %v247_v43 }
  0xd8   : > { %v261_v44 = vpop.permute.xlu1 %260  ;;  %v259_v45 = vpop.permute.xlu0 %258 }
  0xd9   : > { %v287_v48 = vsel %vm283_vm1, %v282_v46, %v261_v44  ;;  %v286_v49 = vsel %vm283_vm1, %v281_v47, %v259_v45 }
  0xdc   : > { %v273_v50 = vpop.permute.xlu1 %272  ;;  %v271_v51 = vpop.permute.xlu0 %270 }
  0xdd   : > { %v292_v52 = vsel %vm288_vm4, %v287_v48, %v273_v50  ;;  %v291_v53 = vsel %vm288_vm4, %v286_v49, %v271_v51 }
  0xde   : > { %687 = vmatprep.mubr.msk.f32.mxu0 %vm305_vm9, %v291_v53 }
  0xdf   : > { %688 = vmatmul.mubr.msk.f32.gmra.mrb[2].mxu0 %vm298_vm10, %v292_v52 }
 0x1a6   : > { %v686_v60 = vpop.f32.mrb[0].mxu0 }
 0x1a7   : > { %v377_v61 = vpop.f32.mrb[1].mxu0 }
 0x1a8   : > { %v733_v62 = vpack.c.bf16 %v686_v60, %v377_v61 }
 0x1aa   : > { %734 = vmatprep.subr.bf16.mxu1 %v733_v62 }
 0x1ab   : > { %736 = vmatpush3.bf16.msra.mxu1 %v733_v62 }
 0x1b2   : > { %v689_v63 = vpop.f32.mrb[2].mxu0 }
 0x1b3   : > { %v387_v0 = vpop.f32.mrb[3].mxu0 }
 0x1b4   : > { %v737_v1 = vpack.c.bf16 %v689_v63, %v387_v0 }
 0x1b6   : > { %738 = vmatprep.subr.bf16.mxu1 %v737_v1 }
 0x1b7   : > { %740 = vmatpush3.bf16.msra.mxu1 %v737_v1 }
 0x1ba   : > { %699 = vmatmul.mubr.msk.f32.vlgmr.msra.gmra.mrb[0].mxu1 %vm278_vm0, %v616_v59 }
 0x28d   : > { %v700_v2 = vpop.f32.mrb[0].mxu1 }
 0x28e   : > { %492 = vst [vmem:[%s214_s27 + $0x8] sm:$0xff] %v700_v2  ;;  %v482_v3 = vpop.f32.mrb[1].mxu1 }
 0x28f   : > { %491 = vst [vmem:[%s214_s27] sm:$0xff] %v482_v3 }
 0x290   : > { %877 = shalt.err (!%p874_p9)
}
 0x291   : > { %s878_s8 = scalar_lea.hbm %s1178_s22, 256  ;;  %s882_s4 = scalar_lea.hbm %s1225_s3, 512 }
 0x292   : > { %p879_p1 = scmp.ne.s32.totalorder %s1178_s22, %s878_s8  ;;  %p883_p11 = scmp.lt.u32.totalorder %s1178_s22, %s1225_s3 }
 0x293   : > { %p884_p2 = scmp.lt.u32.totalorder %s882_s4, %s878_s8  ;;  %p886_p6 = scmp.lt.u32.totalorder %s878_s8, %s1178_s22 }
 0x294   : > { %p880_p0 = pnand %p879_p1, %p1061_p12 }
 0x295   : > { %p885_p4 = por %p884_p2, %p883_p11 }
 0x296   : > { %p881_p5 = pneg %p880_p0 }
 0x297   : > { %p887_p8 = por %p886_p6, %p885_p4 }
 0x299   : > { %p888_p10 = pnand %p887_p8, %p881_p5 }
 0x29b   : > { %891 = shalt.err (!%p888_p10)
}
 0x29c   : > { %s945_s5 = smov 128   ;;  %s946_s27 = smov 8  }
 0x29d   : > { %747 = dma.vmem_to_hbm [thread:$0]  (%p1061_p12), %s1173_s28, 256, %s1178_s22, %s494_s7, %s945_s5, %s945_s5, %s946_s27  }
 0x29e PF: > { %s522_s23 = sand.u32 1, %s922_s12   ;;  %p1240_p13 = scmp.ne.s32.totalorder %s1230_s19, 0 }
 0x29f   : > { %p1241_p3 = scmp.ge.s32.totalorder %s934_s15, 2  ;;  %s523_s29 = scalar_lea.sflag [#allocation4], %s522_s23 }
 0x2a1   : > { %p758_p7 = pnand %p1241_p3, %p1240_p13 }
 0x2a3   : > { %917 = dma.done.wait (!%p758_p7), %s523_s29, 256  }
 0x2a4   : > { %919 = vsyncadd (!%p758_p7), %s523_s29, 4294967040  ;;  %p17_p9 = scmp.ge.s32.totalorder %s1023_s24, 4   ;;  %s1242_s12 = smov %s926_s13 }
 0x2a5   : > { %s1243_s13 = smov %s930_s14  ;;  %s1244_s14 = smov %s1057_s17 }
 0x2a6   : > { %s1245_s15 = smov %s1023_s24  ;;  %19 = sbr.rel (!%p17_p9) target bundleno = 6 (0x6), region = 84 }
 0x2ad   :  { %528 = vsyncpa [#allocation3], 1 }
 0x2ae   :  { %530 = vsyncpa [#allocation3 + $0x1], 1 }
 0x2af   :  { %531 = vsyncpa [#allocation6], 1 }
 0x2b0   :  { %532 = vsyncpa [#allocation4], 1 }
 0x2b1   :  { %534 = vsyncpa [#allocation4 + $0x1], 1 }

</bundles_post_ra>
